<compile_context>
chip_gen: v7x
topology: tpu7x:2x2x1
jax: 0.10.0
libtpu: 0.0.40
codegen_flags: <defaults>
</compile_context>

<pallas_src>
import functools

import jax
import jax.numpy as jnp
from jax.experimental import pallas as pl
from jax.experimental.pallas import tpu as pltpu

SUBLANE = 8


def _round_up(n, m):
    return ((n + m - 1) // m) * m


def fifa_mlp_kernel(x_ref,
                    w1_ref, b1_ref,
                    w2_ref, b2_ref,
                    w3_ref, b3_ref,
                    w4_ref, b4_ref,
                    w5_ref, b5_ref,
                    logits_ref, probs_ref,
                    *, inv_temperature):
    """One batch tile of the fifa_model forward; all weights are VMEM-resident."""

    def layer(h_bf16, w_ref, b_ref):
        # bf16 MXU operands, f32 accumulation; bias + ReLU in f32 on the VPU,
        # then a single cast so activations stay half-width between layers.
        y = jnp.dot(h_bf16, w_ref[...],
                    preferred_element_type=jnp.float32) + b_ref[...]
        return jnp.maximum(y, 0.0).astype(jnp.bfloat16)

    h = x_ref[...].astype(jnp.bfloat16)            # (TILE_B, D_in)
    h = layer(h, w1_ref, b1_ref)                   # fc1 + bn1 + relu
    h = layer(h, w2_ref, b2_ref)                   # fc2 + bn2 + relu (dropout = id, eval)
    h = layer(h, w3_ref, b3_ref)                   # fc3 + bn3 + relu (dropout = id, eval)
    h = layer(h, w4_ref, b4_ref)                   # fc4 + bn4 + relu
    logits = jnp.dot(h, w5_ref[...],
                     preferred_element_type=jnp.float32) + b5_ref[...]  # (TILE_B, C)
    logits_ref[...] = logits

    # softmax(logits / temperature) over the (unpadded) class dim.
    s = logits * inv_temperature
    s = s - jnp.max(s, axis=-1, keepdims=True)
    e = jnp.exp(s)
    denom = jnp.sum(e, axis=-1, keepdims=True)
    probs_ref[...] = e * pl.reciprocal(denom, approx=True)


def prepare_params(folded_params):
    """One-time setup: cast matmul weights to bf16, reshape biases to (1, N) f32.

    Hoisted out of the per-call hot path so fifa_model_forward launches straight
    into the Pallas kernel with no XLA pad/cast ops.
    """
    prepared = []
    for w, b in folded_params:
        prepared.append((jnp.asarray(w, jnp.bfloat16),
                         jnp.reshape(jnp.asarray(b, jnp.float32), (1, -1))))
    return prepared


def fifa_model_forward(x, prepared_params, temperature=1.0, tile_b=1024):
    """prepared_params: 5 (W[in,out] bf16, b[1,out] f32) with eval-mode BN folded in."""
    B, D_in = x.shape
    num_classes = prepared_params[-1][0].shape[1]

    # Big batch tile to amortize per-grid-step overhead, clamped so the grid keeps
    # >= 2 programs (feeds both v7x TensorCores; neutral on v5e/v6e).
    tile_b = max(SUBLANE, min(tile_b, _round_up(pl.cdiv(B, 2), SUBLANE)))
    grid = (pl.cdiv(B, tile_b),)
    # Ragged last block is fine: OOB input rows are garbage but every op is
    # row-wise, and OOB output rows are discarded by Pallas — no padding copy.

    flat = []
    in_specs = [pl.BlockSpec((tile_b, D_in), lambda i: (i, 0))]
    # TODO(synk): if a trace shows the x DMA exposed at large tile_b, add
    #             pipeline_mode=pl.Buffered(3) to the x BlockSpec above.
    for w, b in prepared_params:
        flat += [w, b]
        in_specs += [pl.BlockSpec(w.shape, lambda i: (0, 0)),
                     pl.BlockSpec(b.shape, lambda i: (0, 0))]
    out_spec = pl.BlockSpec((tile_b, num_classes), lambda i: (i, 0))

    flops = 2 * B * sum(w.shape[0] * w.shape[1] for w, _ in prepared_params)
    transcendentals = B * num_classes + B            # exp + reciprocal
    bytes_accessed = (x.size * x.dtype.itemsize
                      + sum(w.size * 2 + b.size * 4 for w, b in prepared_params)
                      + 2 * B * num_classes * 4)

    kernel = functools.partial(fifa_mlp_kernel,
                               inv_temperature=float(1.0 / temperature))

    logits, probs = pl.pallas_call(
        kernel,
        out_shape=(jax.ShapeDtypeStruct((B, num_classes), jnp.float32),
                   jax.ShapeDtypeStruct((B, num_classes), jnp.float32)),
        grid=grid,
        in_specs=in_specs,
        out_specs=(out_spec, out_spec),
        compiler_params=pltpu.CompilerParams(
            dimension_semantics=("parallel",)),
        cost_estimate=pl.CostEstimate(flops=flops,
                                      transcendentals=transcendentals,
                                      bytes_accessed=bytes_accessed),
    )(x, *flat)

    return logits, probs


def init_params(key, input_dim, num_classes, eps=1e-5):
    """Synthetic parameters matching fifa_model shapes, with eval-mode BN folded.

    Linear W,b ~ U(-1/sqrt(fan_in), 1/sqrt(fan_in)); BatchNorm1d gamma/beta/
    running stats are synthetic and folded: scale = gamma/sqrt(var+eps),
    W' = W*scale, b' = (b-mean)*scale + beta. Returns f32 (W[in,out], b[out]).
    """
    dims = [input_dim, 128, 64, 32, 16, num_classes]
    linears = []
    for i in range(5):
        key, kw, kb = jax.random.split(key, 3)
        fan_in, fan_out = dims[i], dims[i + 1]
        bound = 1.0 / (fan_in ** 0.5)
        w = jax.random.uniform(kw, (fan_in, fan_out), jnp.float32, -bound, bound)
        b = jax.random.uniform(kb, (fan_out,), jnp.float32, -bound, bound)
        linears.append((w, b))

    folded = []
    for i in range(4):  # bn1..bn4 follow fc1..fc4
        key, kg, kbe, km, kv = jax.random.split(key, 5)
        n = dims[i + 1]
        gamma = 1.0 + 0.1 * jax.random.normal(kg, (n,), jnp.float32)
        beta = 0.1 * jax.random.normal(kbe, (n,), jnp.float32)
        mean = 0.1 * jax.random.normal(km, (n,), jnp.float32)
        var = jnp.abs(jax.random.normal(kv, (n,), jnp.float32)) + 0.5
        scale = gamma * jax.lax.rsqrt(var + eps)
        w, b = linears[i]
        folded.append((w * scale[None, :], (b - mean) * scale + beta))

    folded.append(linears[4])
    return folded


def reference_forward(x, prepared_params, temperature=1.0):
    """Pure-JAX reference at matching precision (bf16 operands, f32 accumulate)."""
    h = x
    for w, b in prepared_params[:4]:
        h = jnp.dot(h.astype(jnp.bfloat16), w, preferred_element_type=jnp.float32) + b
        h = jnp.maximum(h, 0.0)
    w5, b5 = prepared_params[4]
    logits = jnp.dot(h.astype(jnp.bfloat16), w5,
                     preferred_element_type=jnp.float32) + b5
    s = logits / temperature
    s = s - jnp.max(s, axis=-1, keepdims=True)
    e = jnp.exp(s)
    return logits, e / jnp.sum(e, axis=-1, keepdims=True)


if __name__ == "__main__":
    key = jax.random.PRNGKey(0)
    batch, input_dim, num_classes = 256, 32, 8   # -> grid of 2 batch tiles of 128

    key, kx, kp = jax.random.split(key, 3)
    x = jax.random.normal(kx, (batch, input_dim), jnp.float32)
    params = prepare_params(init_params(kp, input_dim, num_classes))

    logits, probs = fifa_model_forward(x, params, temperature=1.0)
    logits, probs = jax.block_until_ready((logits, probs))

    ref_logits, ref_probs = reference_forward(x, params, temperature=1.0)
    assert logits.shape == (batch, num_classes)
    assert probs.shape == (batch, num_classes)
    assert jnp.allclose(logits, ref_logits, atol=1e-3, rtol=1e-3)
    assert jnp.allclose(probs, ref_probs, atol=5e-3, rtol=5e-3)
    assert jnp.allclose(jnp.sum(probs, axis=1), 1.0, atol=5e-3)

    print("KERNEL_OK")
</pallas_src>

<mosaic_0001>
module attributes {stable_mosaic.version = 11 : i64} {
  func.func @fifa_mlp_kernel(%arg0: i32, %arg1: memref<128x32xf32, #tpu.memory_space<vmem>>, %arg2: memref<32x128xbf16, #tpu.memory_space<vmem>>, %arg3: memref<1x128xf32, #tpu.memory_space<vmem>>, %arg4: memref<128x64xbf16, #tpu.memory_space<vmem>>, %arg5: memref<1x64xf32, #tpu.memory_space<vmem>>, %arg6: memref<64x32xbf16, #tpu.memory_space<vmem>>, %arg7: memref<1x32xf32, #tpu.memory_space<vmem>>, %arg8: memref<32x16xbf16, #tpu.memory_space<vmem>>, %arg9: memref<1x16xf32, #tpu.memory_space<vmem>>, %arg10: memref<16x8xbf16, #tpu.memory_space<vmem>>, %arg11: memref<1x8xf32, #tpu.memory_space<vmem>>, %arg12: memref<128x8xf32, #tpu.memory_space<vmem>>, %arg13: memref<128x8xf32, #tpu.memory_space<vmem>>) attributes {dimension_semantics = [#tpu.dimension_semantics<parallel>], iteration_bounds = array<i64: 2>, scalar_prefetch = 0 : i64, scratch_operands = 0 : i64, tpu.core_type = #tpu.core_type<tc>, window_params = [{transform_indices = @transform_0, window_bounds = array<i64: 128, 32>}, {pipeline_mode = #tpu.pipeline_mode<synchronous>, transform_indices = @transform_1, window_bounds = array<i64: 32, 128>}, {pipeline_mode = #tpu.pipeline_mode<synchronous>, transform_indices = @transform_2, window_bounds = array<i64: 1, 128>}, {pipeline_mode = #tpu.pipeline_mode<synchronous>, transform_indices = @transform_3, window_bounds = array<i64: 128, 64>}, {pipeline_mode = #tpu.pipeline_mode<synchronous>, transform_indices = @transform_4, window_bounds = array<i64: 1, 64>}, {pipeline_mode = #tpu.pipeline_mode<synchronous>, transform_indices = @transform_5, window_bounds = array<i64: 64, 32>}, {pipeline_mode = #tpu.pipeline_mode<synchronous>, transform_indices = @transform_6, window_bounds = array<i64: 1, 32>}, {pipeline_mode = #tpu.pipeline_mode<synchronous>, transform_indices = @transform_7, window_bounds = array<i64: 32, 16>}, {pipeline_mode = #tpu.pipeline_mode<synchronous>, transform_indices = @transform_8, window_bounds = array<i64: 1, 16>}, {pipeline_mode = #tpu.pipeline_mode<synchronous>, transform_indices = @transform_9, window_bounds = array<i64: 16, 8>}, {pipeline_mode = #tpu.pipeline_mode<synchronous>, transform_indices = @transform_10, window_bounds = array<i64: 1, 8>}, {transform_indices = @transform_11, window_bounds = array<i64: 128, 8>}, {transform_indices = @transform_12, window_bounds = array<i64: 128, 8>}]} {
    %c0 = arith.constant 0 : index
    %c0_0 = arith.constant 0 : index
    %0 = vector.load %arg1[%c0, %c0_0] : memref<128x32xf32, #tpu.memory_space<vmem>>, vector<128x32xf32>
    %1 = arith.truncf %0 : vector<128x32xf32> to vector<128x32xbf16>
    %c0_1 = arith.constant 0 : index
    %c0_2 = arith.constant 0 : index
    %2 = vector.load %arg2[%c0_1, %c0_2] : memref<32x128xbf16, #tpu.memory_space<vmem>>, vector<32x128xbf16>
    %cst = arith.constant dense<0.000000e+00> : vector<128x128xf32>
    %3 = tpu.matmul %1, %2, %cst {dimension_numbers = #tpu.dot_dimension_numbers<[1], [0], [0], [1], [0, 0, 1, 1], [], []>} : vector<128x32xbf16>, vector<32x128xbf16>, vector<128x128xf32> -> vector<128x128xf32>
    %c0_3 = arith.constant 0 : index
    %c0_4 = arith.constant 0 : index
    %4 = vector.load %arg3[%c0_3, %c0_4] : memref<1x128xf32, #tpu.memory_space<vmem>>, vector<1x128xf32>
    %5 = vector.broadcast %4 : vector<1x128xf32> to vector<128x128xf32>
    %6 = arith.addf %3, %5 : vector<128x128xf32>
    %cst_5 = arith.constant 0.000000e+00 : f32
    %7 = vector.broadcast %cst_5 : f32 to vector<128x128xf32>
    %8 = arith.maximumf %6, %7 : vector<128x128xf32>
    %9 = arith.truncf %8 : vector<128x128xf32> to vector<128x128xbf16>
    %c0_6 = arith.constant 0 : index
    %c0_7 = arith.constant 0 : index
    %10 = vector.load %arg4[%c0_6, %c0_7] : memref<128x64xbf16, #tpu.memory_space<vmem>>, vector<128x64xbf16>
    %cst_8 = arith.constant dense<0.000000e+00> : vector<128x64xf32>
    %11 = tpu.matmul %9, %10, %cst_8 {dimension_numbers = #tpu.dot_dimension_numbers<[1], [0], [0], [1], [0, 0, 1, 1], [], []>} : vector<128x128xbf16>, vector<128x64xbf16>, vector<128x64xf32> -> vector<128x64xf32>
    %c0_9 = arith.constant 0 : index
    %c0_10 = arith.constant 0 : index
    %12 = vector.load %arg5[%c0_9, %c0_10] : memref<1x64xf32, #tpu.memory_space<vmem>>, vector<1x64xf32>
    %13 = vector.broadcast %12 : vector<1x64xf32> to vector<128x64xf32>
    %14 = arith.addf %11, %13 : vector<128x64xf32>
    %cst_11 = arith.constant 0.000000e+00 : f32
    %15 = vector.broadcast %cst_11 : f32 to vector<128x64xf32>
    %16 = arith.maximumf %14, %15 : vector<128x64xf32>
    %17 = arith.truncf %16 : vector<128x64xf32> to vector<128x64xbf16>
    %c0_12 = arith.constant 0 : index
    %c0_13 = arith.constant 0 : index
    %18 = vector.load %arg6[%c0_12, %c0_13] : memref<64x32xbf16, #tpu.memory_space<vmem>>, vector<64x32xbf16>
    %cst_14 = arith.constant dense<0.000000e+00> : vector<128x32xf32>
    %19 = tpu.matmul %17, %18, %cst_14 {dimension_numbers = #tpu.dot_dimension_numbers<[1], [0], [0], [1], [0, 0, 1, 1], [], []>} : vector<128x64xbf16>, vector<64x32xbf16>, vector<128x32xf32> -> vector<128x32xf32>
    %c0_15 = arith.constant 0 : index
    %c0_16 = arith.constant 0 : index
    %20 = vector.load %arg7[%c0_15, %c0_16] : memref<1x32xf32, #tpu.memory_space<vmem>>, vector<1x32xf32>
    %21 = vector.broadcast %20 : vector<1x32xf32> to vector<128x32xf32>
    %22 = arith.addf %19, %21 : vector<128x32xf32>
    %cst_17 = arith.constant 0.000000e+00 : f32
    %23 = vector.broadcast %cst_17 : f32 to vector<128x32xf32>
    %24 = arith.maximumf %22, %23 : vector<128x32xf32>
    %25 = arith.truncf %24 : vector<128x32xf32> to vector<128x32xbf16>
    %c0_18 = arith.constant 0 : index
    %c0_19 = arith.constant 0 : index
    %26 = vector.load %arg8[%c0_18, %c0_19] : memref<32x16xbf16, #tpu.memory_space<vmem>>, vector<32x16xbf16>
    %cst_20 = arith.constant dense<0.000000e+00> : vector<128x16xf32>
    %27 = tpu.matmul %25, %26, %cst_20 {dimension_numbers = #tpu.dot_dimension_numbers<[1], [0], [0], [1], [0, 0, 1, 1], [], []>} : vector<128x32xbf16>, vector<32x16xbf16>, vector<128x16xf32> -> vector<128x16xf32>
    %c0_21 = arith.constant 0 : index
    %c0_22 = arith.constant 0 : index
    %28 = vector.load %arg9[%c0_21, %c0_22] : memref<1x16xf32, #tpu.memory_space<vmem>>, vector<1x16xf32>
    %29 = vector.broadcast %28 : vector<1x16xf32> to vector<128x16xf32>
    %30 = arith.addf %27, %29 : vector<128x16xf32>
    %cst_23 = arith.constant 0.000000e+00 : f32
    %31 = vector.broadcast %cst_23 : f32 to vector<128x16xf32>
    %32 = arith.maximumf %30, %31 : vector<128x16xf32>
    %33 = arith.truncf %32 : vector<128x16xf32> to vector<128x16xbf16>
    %c0_24 = arith.constant 0 : index
    %c0_25 = arith.constant 0 : index
    %34 = vector.load %arg10[%c0_24, %c0_25] : memref<16x8xbf16, #tpu.memory_space<vmem>>, vector<16x8xbf16>
    %cst_26 = arith.constant dense<0.000000e+00> : vector<128x8xf32>
    %35 = tpu.matmul %33, %34, %cst_26 {dimension_numbers = #tpu.dot_dimension_numbers<[1], [0], [0], [1], [0, 0, 1, 1], [], []>} : vector<128x16xbf16>, vector<16x8xbf16>, vector<128x8xf32> -> vector<128x8xf32>
    %c0_27 = arith.constant 0 : index
    %c0_28 = arith.constant 0 : index
    %36 = vector.load %arg11[%c0_27, %c0_28] : memref<1x8xf32, #tpu.memory_space<vmem>>, vector<1x8xf32>
    %37 = vector.broadcast %36 : vector<1x8xf32> to vector<128x8xf32>
    %38 = arith.addf %35, %37 : vector<128x8xf32>
    %c0_29 = arith.constant 0 : index
    %c0_30 = arith.constant 0 : index
    %39 = vector.load %arg12[%c0_29, %c0_30] : memref<128x8xf32, #tpu.memory_space<vmem>>, vector<128x8xf32>
    tpu.vector_store %arg12[%c0_29, %c0_30], %38 {strides = array<i32>} : memref<128x8xf32, #tpu.memory_space<vmem>>, vector<128x8xf32>,
    %cst_31 = arith.constant 1.000000e+00 : f32
    %40 = vector.broadcast %cst_31 : f32 to vector<128x8xf32>
    %41 = arith.mulf %38, %40 : vector<128x8xf32>
    %cst_32 = arith.constant dense<0xFF800000> : vector<128xf32>
    %42 = vector.multi_reduction <maximumf>, %41, %cst_32 [1] : vector<128x8xf32> to vector<128xf32>
    %43 = vector.shape_cast %42 : vector<128xf32> to vector<128x1xf32>
    %44 = vector.broadcast %43 : vector<128x1xf32> to vector<128x8xf32>
    %45 = arith.subf %41, %44 : vector<128x8xf32>
    %46 = math.exp %45 : vector<128x8xf32>
    %cst_33 = arith.constant dense<0.000000e+00> : vector<128xf32>
    %47 = vector.multi_reduction <add>, %46, %cst_33 [1] : vector<128x8xf32> to vector<128xf32>
    %48 = vector.shape_cast %47 : vector<128xf32> to vector<128x1xf32>
    %49 = tpu.reciprocal %48 {approx = true} : vector<128x1xf32> -> vector<128x1xf32>
    %50 = vector.broadcast %49 : vector<128x1xf32> to vector<128x8xf32>
    %51 = arith.mulf %46, %50 : vector<128x8xf32>
    %c0_34 = arith.constant 0 : index
    %c0_35 = arith.constant 0 : index
    %52 = vector.load %arg13[%c0_34, %c0_35] : memref<128x8xf32, #tpu.memory_space<vmem>>, vector<128x8xf32>
    tpu.vector_store %arg13[%c0_34, %c0_35], %51 {strides = array<i32>} : memref<128x8xf32, #tpu.memory_space<vmem>>, vector<128x8xf32>,
    return
  }
  func.func @transform_0(%arg0: i32) -> (i32, i32) {
    %c0_i32 = arith.constant 0 : i32
    %c0_i32_0 = arith.constant 0 : i32
    return %arg0, %c0_i32 : i32, i32
  }
  func.func @transform_1(%arg0: i32) -> (i32, i32) {
    %c0_i32 = arith.constant 0 : i32
    %c0_i32_0 = arith.constant 0 : i32
    %c0_i32_1 = arith.constant 0 : i32
    return %c0_i32, %c0_i32_0 : i32, i32
  }
  func.func @transform_2(%arg0: i32) -> (i32, i32) {
    %c0_i32 = arith.constant 0 : i32
    %c0_i32_0 = arith.constant 0 : i32
    %c0_i32_1 = arith.constant 0 : i32
    return %c0_i32, %c0_i32_0 : i32, i32
  }
  func.func @transform_3(%arg0: i32) -> (i32, i32) {
    %c0_i32 = arith.constant 0 : i32
    %c0_i32_0 = arith.constant 0 : i32
    %c0_i32_1 = arith.constant 0 : i32
    return %c0_i32, %c0_i32_0 : i32, i32
  }
  func.func @transform_4(%arg0: i32) -> (i32, i32) {
    %c0_i32 = arith.constant 0 : i32
    %c0_i32_0 = arith.constant 0 : i32
    %c0_i32_1 = arith.constant 0 : i32
    return %c0_i32, %c0_i32_0 : i32, i32
  }
  func.func @transform_5(%arg0: i32) -> (i32, i32) {
    %c0_i32 = arith.constant 0 : i32
    %c0_i32_0 = arith.constant 0 : i32
    %c0_i32_1 = arith.constant 0 : i32
    return %c0_i32, %c0_i32_0 : i32, i32
  }
  func.func @transform_6(%arg0: i32) -> (i32, i32) {
    %c0_i32 = arith.constant 0 : i32
    %c0_i32_0 = arith.constant 0 : i32
    %c0_i32_1 = arith.constant 0 : i32
    return %c0_i32, %c0_i32_0 : i32, i32
  }
  func.func @transform_7(%arg0: i32) -> (i32, i32) {
    %c0_i32 = arith.constant 0 : i32
    %c0_i32_0 = arith.constant 0 : i32
    %c0_i32_1 = arith.constant 0 : i32
    return %c0_i32, %c0_i32_0 : i32, i32
  }
  func.func @transform_8(%arg0: i32) -> (i32, i32) {
    %c0_i32 = arith.constant 0 : i32
    %c0_i32_0 = arith.constant 0 : i32
    %c0_i32_1 = arith.constant 0 : i32
    return %c0_i32, %c0_i32_0 : i32, i32
  }
  func.func @transform_9(%arg0: i32) -> (i32, i32) {
    %c0_i32 = arith.constant 0 : i32
    %c0_i32_0 = arith.constant 0 : i32
    %c0_i32_1 = arith.constant 0 : i32
    return %c0_i32, %c0_i32_0 : i32, i32
  }
  func.func @transform_10(%arg0: i32) -> (i32, i32) {
    %c0_i32 = arith.constant 0 : i32
    %c0_i32_0 = arith.constant 0 : i32
    %c0_i32_1 = arith.constant 0 : i32
    return %c0_i32, %c0_i32_0 : i32, i32
  }
  func.func @transform_11(%arg0: i32) -> (i32, i32) {
    %c0_i32 = arith.constant 0 : i32
    %c0_i32_0 = arith.constant 0 : i32
    return %arg0, %c0_i32 : i32, i32
  }
  func.func @transform_12(%arg0: i32) -> (i32, i32) {
    %c0_i32 = arith.constant 0 : i32
    %c0_i32_0 = arith.constant 0 : i32
    return %arg0, %c0_i32 : i32, i32
  }
}

</mosaic_0001>

<bundles_post_ra>
// kernel: tpu_custom_call.1
= control target key start
LH: loop header
LB: loop body
LE: loop exit
PB: predicated region body
PF: predicated region fallthrough
CT: control target
= control target key end

     0   :  { %s2006_s21 = smov 0   ;;  %s2409_s0 = inlined_call_operand.vmem [shape: f32[256,32], index: 0, kind: input, shape index: {}]   ;;  %s2410_s1 = inlined_call_operand.vmem [shape: bf16[32,128], index: 1, kind: input, shape index: {}]   ;;  %s2411_s2 = inlined_call_operand.vmem [shape: f32[1,128], index: 2, kind: input, shape index: {}]   ;;  %s2412_s3 = inlined_call_operand.vmem [shape: bf16[128,64], index: 3, kind: input, shape index: {}]   ;;  %s2413_s4 = inlined_call_operand.vmem [shape: f32[1,64], index: 4, kind: input, shape index: {}]   ;;  %s2414_s5 = inlined_call_operand.vmem [shape: bf16[64,32], index: 5, kind: input, shape index: {}]   ;;  %s2415_s6 = inlined_call_operand.vmem [shape: f32[1,32], index: 6, kind: input, shape index: {}]   ;;  %s2416_s7 = inlined_call_operand.vmem [shape: bf16[32,16], index: 7, kind: input, shape index: {}]   ;;  %s2417_s8 = inlined_call_operand.vmem [shape: f32[1,16], index: 8, kind: input, shape index: {}]   ;;  %s2418_s9 = inlined_call_operand.vmem [shape: bf16[16,8], index: 9, kind: input, shape index: {}]   ;;  %s2419_s10 = inlined_call_operand.vmem [shape: f32[1,8], index: 10, kind: input, shape index: {}]   ;;  %s2420_s11 = inlined_call_operand.vmem [shape: f32[256,8], index: 11, kind: output, shape index: {0}]   ;;  %s2421_s12 = inlined_call_operand.vmem [shape: f32[256,8], index: 12, kind: output, shape index: {1}]  }
   0x1 LB: > { %s1606_s22 = sadd.s32 4294967295, %s1939_s21   ;;  %p1610_p0 = scmp.ge.s32.totalorder %s1939_s21, 1  ;;  %s1939_s21 = sphi %s2006_s21, %s23_s21  }
   0x2   : > { %p366_p1 = scmp.lt.s32.totalorder %s1939_s21, 3 }
   0x4   : > { %p367_p2 = pnand %p1610_p0, %p366_p1 }
   0x5   : > { %v1852_v0 = vld [vmem:[%s2410_s1] sm:$0xff] (!%p367_p2)   ;;  %s1611_s25 = sshll.u32 (!%p367_p2), %s1606_s22, 4  ;;  %v1853_v1 = vld [vmem:[%s2410_s1 + $0x8] sm:$0xff] (!%p367_p2)   ;;  %v1856_v4 = vld [vmem:[%s2412_s3 + $0x10] sm:$0xff] (!%p367_p2)   ;;  %vm479_vm0 = vcmask (!%p367_p2), 261120   ;;  %vm856_vm1 = vcmask (!%p367_p2), 523264  }
   0x6   : > { %370 = sbr.rel (%p367_p2) target bundleno = 1469 (0x5bd), region = 64  ;;  %p414_p3 = scmp.lt.s32.totalorder (!%p367_p2), %s1611_s25, 31  ;;  %1730 = vmatprep.subr.bf16.mxu0 (!%p367_p2), %v1852_v0  ;;  %v1854_v2 = vld [vmem:[%s2412_s3] sm:$0xff] (!%p367_p2)   ;;  %v1855_v3 = vld [vmem:[%s2412_s3 + $0x8] sm:$0xff] (!%p367_p2)   ;;  %v1857_v14 = vld [vmem:[%s2412_s3 + $0x18] sm:$0xff] (!%p367_p2)   ;;  %vm1185_vm2 = vcmask (!%p367_p2), 130048  }
   0x7   : > { %1731 = vmatpush3.bf16.msra.mxu0 (!%p367_p2), %v1852_v0  ;;  %1750 = vmatprep.subr.bf16.mxu1 (!%p367_p2), %v1854_v2  ;;  %v1858_v18 = vld [vmem:[%s2412_s3 + $0x20] sm:$0xff] (!%p367_p2)   ;;  %v1859_v22 = vld [vmem:[%s2412_s3 + $0x28] sm:$0xff] (!%p367_p2)   ;;  %v1860_v32 = vld [vmem:[%s2412_s3 + $0x30] sm:$0xff] (!%p367_p2)   ;;  %vm1307_vm3 = vcmask (!%p367_p2), 64512  }
   0x8   : > { %1732 = vmatprep.subr.bf16.mxu0 (!%p367_p2), %v1853_v1  ;;  %1751 = vmatpush3.bf16.msra.mxu1 (!%p367_p2), %v1854_v2  ;;  %v1861_v33 = vld [vmem:[%s2412_s3 + $0x38] sm:$0xff] (!%p367_p2)   ;;  %v1862_v34 = vld [vmem:[%s2414_s5] sm:$0xff] (!%p367_p2)   ;;  %v1863_v35 = vld [vmem:[%s2414_s5 + $0x8] sm:$0xff] (!%p367_p2)  }
   0x9   : > { %1752 = vmatprep.subr.bf16.mxu1 (!%p367_p2), %v1855_v3  ;;  %v1864_v36 = vld [vmem:[%s2414_s5 + $0x10] sm:$0xff] (!%p367_p2)   ;;  %v1617_v37 = vld [vmem:[%s2411_s2] ss:$0 sm:$0xff] (!%p367_p2) }
   0xb   : > { %1733 = vmatpush3.bf16.msra.mxu0 (!%p367_p2), %v1853_v1 }
   0xc   : > { %1753 = vmatpush3.bf16.msra.mxu1 (!%p367_p2), %v1855_v3  ;;  %1782 = vmatprep.subr.bf16.mxu0 (!%p367_p2), %v1862_v34 }
   0xd   : > { %s2423_s25 = smov (!%p414_p3, %s1611_s25), 31  ;;  %1754 = vmatprep.subr.bf16.mxu1 %v1856_v4 }
   0xe   : > { %s2026_s14 = sshll.u32 %s2423_s25, 3 }
   0xf   : > { %s2032_s17 = scalar_lea.vmem %s2409_s0, %s2026_s14  ;;  %s2142_s25 = scalar_lea.vmem %s2420_s11, %s2026_s14 }
  0x10   : > { %v432_v5 = vld [vmem:[%s2032_s17] sm:$0xff]  ;;  %v433_v6 = vld [vmem:[%s2032_s17 + $0x8] sm:$0xff]  ;;  %v434_v7 = vld [vmem:[%s2032_s17 + $0x10] sm:$0xff]  ;;  %1755 = vmatpush3.bf16.msra.mxu1 %v1856_v4  ;;  %s2356_s28 = scalar_lea.vmem %s2421_s12, %s2026_s14 }
  0x11   : > { %v448_v8 = vpack.c.bf16 %v433_v6, %v432_v5  ;;  %v435_v9 = vld [vmem:[%s2032_s17 + $0x18] sm:$0xff]  ;;  %v436_v10 = vld [vmem:[%s2032_s17 + $0x20] sm:$0xff]  ;;  %v437_v11 = vld [vmem:[%s2032_s17 + $0x28] sm:$0xff]  ;;  %1756 = vmatprep.subr.bf16.mxu1 %v1857_v14 }
  0x12   : > { %v449_v12 = vpack.c.bf16 %v435_v9, %v434_v7  ;;  %v450_v13 = vpack.c.bf16 %v437_v11, %v436_v10  ;;  %v438_v15 = vld [vmem:[%s2032_s17 + $0x30] sm:$0xff]  ;;  %v439_v16 = vld [vmem:[%s2032_s17 + $0x38] sm:$0xff]  ;;  %v440_v17 = vld [vmem:[%s2032_s17 + $0x40] sm:$0xff] }
  0x13   : > { %1734 = vmatprep.mubr.msk.bf16.mxu0 %vm479_vm0, %v448_v8  ;;  %v441_v19 = vld [vmem:[%s2032_s17 + $0x48] sm:$0xff]  ;;  %v451_v20 = vpack.c.bf16 %v439_v16, %v438_v15  ;;  %v442_v23 = vld [vmem:[%s2032_s17 + $0x50] sm:$0xff]  ;;  %v443_v24 = vld [vmem:[%s2032_s17 + $0x58] sm:$0xff] }
  0x14   : > { %1735 = vmatmul.mubr.msk.bf16.vlgmr.msra.gmra.mrb[0].mxu0 %vm479_vm0, %v449_v12  ;;  %v452_v21 = vpack.c.bf16 %v441_v19, %v440_v17  ;;  %1757 = vmatpush3.bf16.msra.mxu1 %v1857_v14  ;;  %v444_v25 = vld [vmem:[%s2032_s17 + $0x60] sm:$0xff]  ;;  %v445_v26 = vld [vmem:[%s2032_s17 + $0x68] sm:$0xff]  ;;  %v453_v27 = vpack.c.bf16 %v443_v24, %v442_v23  ;;  %v446_v29 = vld [vmem:[%s2032_s17 + $0x70] sm:$0xff] }
  0x15   : > { %1738 = vmatprep.mubr.msk.bf16.mxu0 %vm479_vm0, %v450_v13  ;;  %1758 = vmatprep.subr.bf16.mxu1 %v1858_v18  ;;  %v454_v28 = vpack.c.bf16 %v445_v26, %v444_v25  ;;  %v447_v30 = vld [vmem:[%s2032_s17 + $0x78] sm:$0xff] }
  0x16   : > { %v455_v31 = vpack.c.bf16 %v447_v30, %v446_v29  ;;  %1783 = vmatpush3.bf16.msra.mxu0 %v1862_v34  ;;  %v1865_v30 = vld [vmem:[%s2414_s5 + $0x18] sm:$0xff]  }
  0x17   : > { %1784 = vmatprep.subr.bf16.mxu0 %v1863_v35 }
  0x18   : > { %1759 = vmatpush3.bf16.msra.mxu1 %v1858_v18 }
  0x19   : > { %1760 = vmatprep.subr.bf16.mxu1 %v1859_v22 }
  0x1a   : > { %1785 = vmatpush3.bf16.msra.mxu0 %v1863_v35 }
  0x1b   : > { %1786 = vmatprep.subr.bf16.mxu0 %v1864_v36 }
  0x1c   : > { %1739 = vmatmul.mubr.msk.bf16.gmra.mrb[4].mxu0 %vm479_vm0, %v451_v20  ;;  %1761 = vmatpush3.bf16.msra.mxu1 %v1859_v22 }
  0x1d   : > { %1742 = vmatprep.mubr.msk.bf16.mxu0 %vm479_vm0, %v452_v21  ;;  %1762 = vmatprep.subr.bf16.mxu1 %v1860_v32 }
  0x1e   : > { %1787 = vmatpush3.bf16.msra.mxu0 %v1864_v36 }
  0x1f   : > { %1788 = vmatprep.subr.bf16.mxu0 %v1865_v30 }
  0x20   : > { %1763 = vmatpush3.bf16.msra.mxu1 %v1860_v32  ;;  %v1867_v32 = vld [vmem:[%s2416_s7 + $0x8] sm:$0xff]  }
  0x21   : > { %1764 = vmatprep.subr.bf16.mxu1 %v1861_v33 }
  0x22   : > { %1789 = vmatpush3.bf16.msra.mxu0 %v1865_v30 }
  0x24   : > { %1743 = vmatmul.mubr.msk.bf16.gmra.mrb[8].mxu0 %vm479_vm0, %v453_v27  ;;  %1765 = vmatpush3.bf16.msra.mxu1 %v1861_v33  ;;  %v1628_v33 = vld [vmem:[%s2413_s4] ss:$0 sm:$0xff] }
  0x25   : > { %1746 = vmatprep.mubr.msk.bf16.mxu0 %vm479_vm0, %v454_v28 }
  0x2c   : > { %1747 = vmatmul.mubr.msk.bf16.gmra.mrb[12].mxu0 %vm479_vm0, %v455_v31  ;;  %v1866_v31 = vld [vmem:[%s2416_s7] sm:$0xff]  }
  0x2d   : > { %1806 = vmatprep.subr.bf16.mxu1 %v1866_v31 }
  0xe7   : > { %v1736_v38 = vpop.f32.mrb[0].mxu0 }
  0xe8   : > { %v547_v39 = vadd.f32 %v1736_v38, %v1617_v37  ;;  %v538_v40 = vpop.f32.mrb[1].mxu0 }
  0xe9   : > { %v539_v41 = vadd.f32 %v1617_v37, %v538_v40  ;;  %v1737_v42 = vpop.f32.mrb[2].mxu0 }
  0xea   : > { %v550_v43 = vadd.f32 %v1737_v42, %v1617_v37  ;;  %v541_v44 = vpop.f32.mrb[3].mxu0  ;;  %v603_v46 = vmax.f32 %v547_v39, 0.0 }
  0xeb   : > { %v542_v45 = vadd.f32 %v1617_v37, %v541_v44  ;;  %v601_v48 = vmax.f32 %v539_v41, 0.0 }
  0xec   : > { %v604_v47 = vmax.f32 %v550_v43, 0.0 }
  0xed   : > { %v602_v49 = vmax.f32 %v542_v45, 0.0 }
  0xee   : > { %v618_v50 = vpack.c.bf16 %v604_v47, %v603_v46 }
  0xef   : > { %v1740_v51 = vpop.f32.mrb[4].mxu0  ;;  %v617_v52 = vpack.c.bf16 %v602_v49, %v601_v48 }
  0xf0   : > { %v563_v53 = vadd.f32 %v1740_v51, %v1617_v37  ;;  %v554_v54 = vpop.f32.mrb[5].mxu0 }
  0xf1   : > { %v555_v55 = vadd.f32 %v1617_v37, %v554_v54  ;;  %v1741_v56 = vpop.f32.mrb[6].mxu0  ;;  %1766 = vmatprep.mubr.bf16.mxu1 %v617_v52 }
  0xf2   : > { %v607_v57 = vmax.f32 %v563_v53, 0.0  ;;  %v566_v58 = vadd.f32 %v1741_v56, %v1617_v37  ;;  %v557_v59 = vpop.f32.mrb[7].mxu0  ;;  %1767 = vmatmul.mubr.bf16.vlgmr.msra.gmra.mrb[0].mxu1 %v618_v50 }
  0xf3   : > { %v558_v60 = vadd.f32 %v1617_v37, %v557_v59  ;;  %v605_v62 = vmax.f32 %v555_v55, 0.0  ;;  %1807 = vmatpush3.bf16.msra.mxu1 %v1866_v31 }
  0xf4   : > { %v608_v61 = vmax.f32 %v566_v58, 0.0  ;;  %1808 = vmatprep.subr.bf16.mxu1 %v1867_v32 }
  0xf5   : > { %v606_v63 = vmax.f32 %v558_v60, 0.0 }
  0xf6   : > { %v620_v0 = vpack.c.bf16 %v608_v61, %v607_v57 }
  0xf7   : > { %v619_v1 = vpack.c.bf16 %v606_v63, %v605_v62  ;;  %v1744_v2 = vpop.f32.mrb[8].mxu0  ;;  %1809 = vmatpush3.bf16.msra.mxu1 %v1867_v32 }
  0xf8   : > { %v579_v3 = vadd.f32 %v1744_v2, %v1617_v37  ;;  %v570_v4 = vpop.f32.mrb[9].mxu0 }
  0xf9   : > { %v571_v5 = vadd.f32 %v1617_v37, %v570_v4  ;;  %v1745_v6 = vpop.f32.mrb[10].mxu0  ;;  %1770 = vmatprep.mubr.bf16.mxu1 %v619_v1 }
  0xfa   : > { %v611_v7 = vmax.f32 %v579_v3, 0.0  ;;  %v582_v8 = vadd.f32 %v1745_v6, %v1617_v37  ;;  %v573_v9 = vpop.f32.mrb[11].mxu0  ;;  %1771 = vmatmul.mubr.bf16.gmra.mrb[4].mxu1 %v620_v0 }
  0xfb   : > { %v574_v10 = vadd.f32 %v1617_v37, %v573_v9  ;;  %v609_v12 = vmax.f32 %v571_v5, 0.0 }
  0xfc   : > { %v612_v11 = vmax.f32 %v582_v8, 0.0 }
  0xfd   : > { %v610_v13 = vmax.f32 %v574_v10, 0.0 }
  0xfe   : > { %v622_v14 = vpack.c.bf16 %v612_v11, %v611_v7 }
  0xff   : > { %v621_v15 = vpack.c.bf16 %v610_v13, %v609_v12  ;;  %v1748_v16 = vpop.f32.mrb[12].mxu0 }
 0x100   : > { %v595_v17 = vadd.f32 %v1748_v16, %v1617_v37  ;;  %v586_v18 = vpop.f32.mrb[13].mxu0 }
 0x101   : > { %v587_v19 = vadd.f32 %v1617_v37, %v586_v18  ;;  %v1749_v20 = vpop.f32.mrb[14].mxu0  ;;  %1774 = vmatprep.mubr.bf16.mxu1 %v621_v15 }
 0x102   : > { %v615_v21 = vmax.f32 %v595_v17, 0.0  ;;  %v598_v22 = vadd.f32 %v1749_v20, %v1617_v37  ;;  %v589_v23 = vpop.f32.mrb[15].mxu0  ;;  %1775 = vmatmul.mubr.bf16.gmra.mrb[8].mxu1 %v622_v14 }
 0x103   : > { %v590_v24 = vadd.f32 %v1617_v37, %v589_v23  ;;  %v613_v26 = vmax.f32 %v587_v19, 0.0 }
 0x104   : > { %v616_v25 = vmax.f32 %v598_v22, 0.0 }
 0x105   : > { %v614_v27 = vmax.f32 %v590_v24, 0.0 }
 0x106   : > { %v624_v28 = vpack.c.bf16 %v616_v25, %v615_v21 }
 0x107   : > { %v623_v29 = vpack.c.bf16 %v614_v27, %v613_v26  ;;  %v1868_v26 = vld [vmem:[%s2418_s9] sm:$0xff]  }
 0x108   : > { %1826 = vmatprep.subr.bf16.mxu0 %v1868_v26  ;;  %v1637_v27 = vld [vmem:[%s2415_s6] ss:$0 sm:$0xff] }
 0x109   : > { %1778 = vmatprep.mubr.bf16.mxu1 %v623_v29 }
 0x10a   : > { %1779 = vmatmul.mubr.bf16.gmra.mrb[12].mxu1 %v624_v28 }
 0x1c5   : > { %v1768_v34 = vpop.f32.mrb[0].mxu1 }
 0x1c6   : > { %v739_v35 = vadd.f32 %v1768_v34, %v1628_v33  ;;  %v730_v36 = vpop.f32.mrb[1].mxu1 }
 0x1c7   : > { %v731_v37 = vadd.f32 %v1628_v33, %v730_v36  ;;  %v1769_v38 = vpop.f32.mrb[2].mxu1 }
 0x1c8   : > { %v742_v39 = vadd.f32 %v1769_v38, %v1628_v33  ;;  %v733_v40 = vpop.f32.mrb[3].mxu1  ;;  %v795_v42 = vmax.f32 %v739_v35, 0.0 }
 0x1c9   : > { %v734_v41 = vadd.f32 %v1628_v33, %v733_v40  ;;  %v793_v44 = vmax.f32 %v731_v37, 0.0 }
 0x1ca   : > { %v796_v43 = vmax.f32 %v742_v39, 0.0 }
 0x1cb   : > { %v794_v45 = vmax.f32 %v734_v41, 0.0 }
 0x1cc   : > { %v810_v46 = vpack.c.bf16 %v796_v43, %v795_v42 }
 0x1cd   : > { %v809_v47 = vpack.c.bf16 %v794_v45, %v793_v44  ;;  %v1772_v48 = vpop.f32.mrb[4].mxu1 }
 0x1ce   : > { %v755_v49 = vadd.f32 %v1772_v48, %v1628_v33  ;;  %v746_v50 = vpop.f32.mrb[5].mxu1 }
 0x1cf   : > { %v747_v51 = vadd.f32 %v1628_v33, %v746_v50  ;;  %v1773_v52 = vpop.f32.mrb[6].mxu1  ;;  %1790 = vmatprep.mubr.msk.bf16.mxu0 %vm856_vm1, %v809_v47 }
 0x1d0   : > { %v758_v53 = vadd.f32 %v1773_v52, %v1628_v33  ;;  %v749_v54 = vpop.f32.mrb[7].mxu1  ;;  %1791 = vmatmul.mubr.msk.bf16.vlgmr.msra.gmra.mrb[16].mxu0 %vm856_vm1, %v810_v46  ;;  %v799_v56 = vmax.f32 %v755_v49, 0.0 }
 0x1d1   : > { %v750_v55 = vadd.f32 %v1628_v33, %v749_v54  ;;  %v797_v58 = vmax.f32 %v747_v51, 0.0  ;;  %1827 = vmatpush3.bf16.msra.mxu0 %v1868_v26 }
 0x1d2   : > { %v800_v57 = vmax.f32 %v758_v53, 0.0 }
 0x1d3   : > { %v798_v59 = vmax.f32 %v750_v55, 0.0 }
 0x1d4   : > { %v812_v60 = vpack.c.bf16 %v800_v57, %v799_v56 }
 0x1d5   : > { %v811_v61 = vpack.c.bf16 %v798_v59, %v797_v58  ;;  %v1776_v62 = vpop.f32.mrb[8].mxu1 }
 0x1d6   : > { %v771_v63 = vadd.f32 %v1776_v62, %v1628_v33  ;;  %v762_v0 = vpop.f32.mrb[9].mxu1 }
 0x1d7   : > { %v763_v1 = vadd.f32 %v1628_v33, %v762_v0  ;;  %v1777_v2 = vpop.f32.mrb[10].mxu1  ;;  %1794 = vmatprep.mubr.msk.bf16.mxu0 %vm856_vm1, %v811_v61 }
 0x1d8   : > { %v774_v3 = vadd.f32 %v1777_v2, %v1628_v33  ;;  %v765_v4 = vpop.f32.mrb[11].mxu1  ;;  %1795 = vmatmul.mubr.msk.bf16.gmra.mrb[20].mxu0 %vm856_vm1, %v812_v60  ;;  %v803_v6 = vmax.f32 %v771_v63, 0.0 }
 0x1d9   : > { %v766_v5 = vadd.f32 %v1628_v33, %v765_v4  ;;  %v801_v8 = vmax.f32 %v763_v1, 0.0 }
 0x1da   : > { %v804_v7 = vmax.f32 %v774_v3, 0.0 }
 0x1db   : > { %v802_v9 = vmax.f32 %v766_v5, 0.0 }
 0x1dc   : > { %v814_v10 = vpack.c.bf16 %v804_v7, %v803_v6 }
 0x1dd   : > { %v813_v11 = vpack.c.bf16 %v802_v9, %v801_v8  ;;  %v1780_v12 = vpop.f32.mrb[12].mxu1 }
 0x1de   : > { %v787_v13 = vadd.f32 %v1780_v12, %v1628_v33  ;;  %v778_v14 = vpop.f32.mrb[13].mxu1 }
 0x1df   : > { %v779_v15 = vadd.f32 %v1628_v33, %v778_v14  ;;  %v1781_v16 = vpop.f32.mrb[14].mxu1  ;;  %1798 = vmatprep.mubr.msk.bf16.mxu0 %vm856_vm1, %v813_v11 }
 0x1e0   : > { %v790_v17 = vadd.f32 %v1781_v16, %v1628_v33  ;;  %v781_v18 = vpop.f32.mrb[15].mxu1  ;;  %1799 = vmatmul.mubr.msk.bf16.gmra.mrb[24].mxu0 %vm856_vm1, %v814_v10  ;;  %v807_v20 = vmax.f32 %v787_v13, 0.0 }
 0x1e1   : > { %v782_v19 = vadd.f32 %v1628_v33, %v781_v18  ;;  %v805_v22 = vmax.f32 %v779_v15, 0.0 }
 0x1e2   : > { %v808_v21 = vmax.f32 %v790_v17, 0.0 }
 0x1e3   : > { %v806_v23 = vmax.f32 %v782_v19, 0.0 }
 0x1e4   : > { %v816_v24 = vpack.c.bf16 %v808_v21, %v807_v20  ;;  %v1650_v20 = vld [vmem:[%s2417_s8] ss:$0 sm:$0xff] }
 0x1e5   : > { %v815_v25 = vpack.c.bf16 %v806_v23, %v805_v22 }
 0x1e7   : > { %1802 = vmatprep.mubr.msk.bf16.mxu0 %vm856_vm1, %v815_v25 }
 0x1e8   : > { %1803 = vmatmul.mubr.msk.bf16.gmra.mrb[28].mxu0 %vm856_vm1, %v816_v24 }
 0x2a3   : > { %v1792_v28 = vpop.f32.mrb[16].mxu0 }
 0x2a4   : > { %v924_v29 = vadd.f32 %v1792_v28, %v1637_v27  ;;  %v915_v30 = vpop.f32.mrb[17].mxu0 }
 0x2a5   : > { %v916_v31 = vadd.f32 %v1637_v27, %v915_v30  ;;  %v1793_v32 = vpop.f32.mrb[18].mxu0 }
 0x2a6   : > { %v927_v33 = vadd.f32 %v1793_v32, %v1637_v27  ;;  %v918_v34 = vpop.f32.mrb[19].mxu0  ;;  %v980_v36 = vmax.f32 %v924_v29, 0.0 }
 0x2a7   : > { %v919_v35 = vadd.f32 %v1637_v27, %v918_v34  ;;  %v978_v38 = vmax.f32 %v916_v31, 0.0 }
 0x2a8   : > { %v981_v37 = vmax.f32 %v927_v33, 0.0 }
 0x2a9   : > { %v979_v39 = vmax.f32 %v919_v35, 0.0 }
 0x2aa   : > { %v995_v40 = vpack.c.bf16 %v981_v37, %v980_v36 }
 0x2ab   : > { %v994_v41 = vpack.c.bf16 %v979_v39, %v978_v38  ;;  %v1796_v42 = vpop.f32.mrb[20].mxu0 }
 0x2ac   : > { %v940_v43 = vadd.f32 %v1796_v42, %v1637_v27  ;;  %v931_v44 = vpop.f32.mrb[21].mxu0 }
 0x2ad   : > { %v932_v45 = vadd.f32 %v1637_v27, %v931_v44  ;;  %v1797_v46 = vpop.f32.mrb[22].mxu0  ;;  %1810 = vmatprep.mubr.msk.bf16.mxu1 %vm479_vm0, %v994_v41 }
 0x2ae   : > { %v943_v47 = vadd.f32 %v1797_v46, %v1637_v27  ;;  %v934_v48 = vpop.f32.mrb[23].mxu0  ;;  %1811 = vmatmul.mubr.msk.bf16.vlgmr.msra.gmra.mrb[16].mxu1 %vm479_vm0, %v995_v40  ;;  %v984_v50 = vmax.f32 %v940_v43, 0.0 }
 0x2af   : > { %v935_v49 = vadd.f32 %v1637_v27, %v934_v48  ;;  %v982_v52 = vmax.f32 %v932_v45, 0.0 }
 0x2b0   : > { %v985_v51 = vmax.f32 %v943_v47, 0.0 }
 0x2b1   : > { %v983_v53 = vmax.f32 %v935_v49, 0.0 }
 0x2b2   : > { %v997_v54 = vpack.c.bf16 %v985_v51, %v984_v50 }
 0x2b3   : > { %v996_v55 = vpack.c.bf16 %v983_v53, %v982_v52  ;;  %v1800_v56 = vpop.f32.mrb[24].mxu0 }
 0x2b4   : > { %v956_v57 = vadd.f32 %v1800_v56, %v1637_v27  ;;  %v947_v58 = vpop.f32.mrb[25].mxu0 }
 0x2b5   : > { %v948_v59 = vadd.f32 %v1637_v27, %v947_v58  ;;  %v1801_v60 = vpop.f32.mrb[26].mxu0  ;;  %1814 = vmatprep.mubr.msk.bf16.mxu1 %vm479_vm0, %v996_v55 }
 0x2b6   : > { %v959_v61 = vadd.f32 %v1801_v60, %v1637_v27  ;;  %v950_v62 = vpop.f32.mrb[27].mxu0  ;;  %1815 = vmatmul.mubr.msk.bf16.gmra.mrb[20].mxu1 %vm479_vm0, %v997_v54  ;;  %v988_v0 = vmax.f32 %v956_v57, 0.0 }
 0x2b7   : > { %v951_v63 = vadd.f32 %v1637_v27, %v950_v62  ;;  %v986_v2 = vmax.f32 %v948_v59, 0.0 }
 0x2b8   : > { %v989_v1 = vmax.f32 %v959_v61, 0.0 }
 0x2b9   : > { %v987_v3 = vmax.f32 %v951_v63, 0.0 }
 0x2ba   : > { %v999_v4 = vpack.c.bf16 %v989_v1, %v988_v0 }
 0x2bb   : > { %v998_v5 = vpack.c.bf16 %v987_v3, %v986_v2  ;;  %v1804_v6 = vpop.f32.mrb[28].mxu0 }
 0x2bc   : > { %v972_v7 = vadd.f32 %v1804_v6, %v1637_v27  ;;  %v963_v8 = vpop.f32.mrb[29].mxu0 }
 0x2bd   : > { %v964_v9 = vadd.f32 %v1637_v27, %v963_v8  ;;  %v1805_v10 = vpop.f32.mrb[30].mxu0  ;;  %1818 = vmatprep.mubr.msk.bf16.mxu1 %vm479_vm0, %v998_v5 }
 0x2be   : > { %v975_v11 = vadd.f32 %v1805_v10, %v1637_v27  ;;  %v966_v12 = vpop.f32.mrb[31].mxu0  ;;  %1819 = vmatmul.mubr.msk.bf16.gmra.mrb[24].mxu1 %vm479_vm0, %v999_v4  ;;  %v992_v14 = vmax.f32 %v972_v7, 0.0 }
 0x2bf   : > { %v967_v13 = vadd.f32 %v1637_v27, %v966_v12  ;;  %v990_v16 = vmax.f32 %v964_v9, 0.0 }
 0x2c0   : > { %v993_v15 = vmax.f32 %v975_v11, 0.0 }
 0x2c1   : > { %v991_v17 = vmax.f32 %v967_v13, 0.0  ;;  %v2136_v13 = vld [vmem:[%s2419_s10] ss:$0 sm:$0xff] }
 0x2c2   : > { %v1001_v18 = vpack.c.bf16 %v993_v15, %v992_v14 }
 0x2c3   : > { %v1000_v19 = vpack.c.bf16 %v991_v17, %v990_v16 }
 0x2c5   : > { %1822 = vmatprep.mubr.msk.bf16.mxu1 %vm479_vm0, %v1000_v19 }
 0x2c6   : > { %1823 = vmatmul.mubr.msk.bf16.gmra.mrb[28].mxu1 %vm479_vm0, %v1001_v18 }
 0x381   : > { %v1812_v21 = vpop.f32.mrb[16].mxu1 }
 0x382   : > { %v1092_v22 = vadd.f32 %v1812_v21, %v1650_v20  ;;  %v1083_v23 = vpop.f32.mrb[17].mxu1 }
 0x383   : > { %v1084_v24 = vadd.f32 %v1650_v20, %v1083_v23  ;;  %v1813_v25 = vpop.f32.mrb[18].mxu1 }
 0x384   : > { %v1095_v26 = vadd.f32 %v1813_v25, %v1650_v20  ;;  %v1086_v27 = vpop.f32.mrb[19].mxu1  ;;  %v1148_v29 = vmax.f32 %v1092_v22, 0.0 }
 0x385   : > { %v1087_v28 = vadd.f32 %v1650_v20, %v1086_v27  ;;  %v1146_v31 = vmax.f32 %v1084_v24, 0.0 }
 0x386   : > { %v1149_v30 = vmax.f32 %v1095_v26, 0.0 }
 0x387   : > { %v1147_v32 = vmax.f32 %v1087_v28, 0.0 }
 0x388   : > { %v1163_v33 = vpack.c.bf16 %v1149_v30, %v1148_v29 }
 0x389   : > { %v1162_v34 = vpack.c.bf16 %v1147_v32, %v1146_v31  ;;  %v1816_v35 = vpop.f32.mrb[20].mxu1 }
 0x38a   : > { %v1108_v36 = vadd.f32 %v1816_v35, %v1650_v20  ;;  %v1099_v37 = vpop.f32.mrb[21].mxu1 }
 0x38b   : > { %v1100_v38 = vadd.f32 %v1650_v20, %v1099_v37  ;;  %v1817_v39 = vpop.f32.mrb[22].mxu1  ;;  %1828 = vmatprep.mubr.msk.bf16.mxu0 %vm1185_vm2, %v1162_v34 }
 0x38c   : > { %v1111_v40 = vadd.f32 %v1817_v39, %v1650_v20  ;;  %v1102_v41 = vpop.f32.mrb[23].mxu1  ;;  %1829 = vmatmul.mubr.msk.bf16.vlgmr.msra.gmra.mrb[32].mxu0 %vm1185_vm2, %v1163_v33  ;;  %v1152_v43 = vmax.f32 %v1108_v36, 0.0 }
 0x38d   : > { %v1103_v42 = vadd.f32 %v1650_v20, %v1102_v41  ;;  %v1150_v45 = vmax.f32 %v1100_v38, 0.0 }
 0x38e   : > { %v1153_v44 = vmax.f32 %v1111_v40, 0.0 }
 0x38f   : > { %v1151_v46 = vmax.f32 %v1103_v42, 0.0 }
 0x390   : > { %v1165_v47 = vpack.c.bf16 %v1153_v44, %v1152_v43 }
 0x391   : > { %v1164_v48 = vpack.c.bf16 %v1151_v46, %v1150_v45  ;;  %v1820_v49 = vpop.f32.mrb[24].mxu1 }
 0x392   : > { %v1124_v50 = vadd.f32 %v1820_v49, %v1650_v20  ;;  %v1115_v51 = vpop.f32.mrb[25].mxu1 }
 0x393   : > { %v1116_v52 = vadd.f32 %v1650_v20, %v1115_v51  ;;  %v1821_v53 = vpop.f32.mrb[26].mxu1  ;;  %1832 = vmatprep.mubr.msk.bf16.mxu0 %vm1185_vm2, %v1164_v48 }
 0x394   : > { %v1127_v54 = vadd.f32 %v1821_v53, %v1650_v20  ;;  %v1118_v55 = vpop.f32.mrb[27].mxu1  ;;  %1833 = vmatmul.mubr.msk.bf16.gmra.mrb[36].mxu0 %vm1185_vm2, %v1165_v47  ;;  %v1156_v57 = vmax.f32 %v1124_v50, 0.0 }
 0x395   : > { %v1119_v56 = vadd.f32 %v1650_v20, %v1118_v55  ;;  %v1154_v59 = vmax.f32 %v1116_v52, 0.0 }
 0x396   : > { %v1157_v58 = vmax.f32 %v1127_v54, 0.0 }
 0x397   : > { %v1155_v60 = vmax.f32 %v1119_v56, 0.0 }
 0x398   : > { %v1167_v61 = vpack.c.bf16 %v1157_v58, %v1156_v57 }
 0x399   : > { %v1166_v62 = vpack.c.bf16 %v1155_v60, %v1154_v59  ;;  %v1824_v63 = vpop.f32.mrb[28].mxu1 }
 0x39a   : > { %v1140_v0 = vadd.f32 %v1824_v63, %v1650_v20  ;;  %v1131_v1 = vpop.f32.mrb[29].mxu1 }
 0x39b   : > { %v1132_v2 = vadd.f32 %v1650_v20, %v1131_v1  ;;  %v1825_v3 = vpop.f32.mrb[30].mxu1  ;;  %1836 = vmatprep.mubr.msk.bf16.mxu0 %vm1185_vm2, %v1166_v62 }
 0x39c   : > { %v1143_v4 = vadd.f32 %v1825_v3, %v1650_v20  ;;  %v1134_v5 = vpop.f32.mrb[31].mxu1  ;;  %1837 = vmatmul.mubr.msk.bf16.gmra.mrb[40].mxu0 %vm1185_vm2, %v1167_v61  ;;  %v1160_v7 = vmax.f32 %v1140_v0, 0.0 }
 0x39d   : > { %v1135_v6 = vadd.f32 %v1650_v20, %v1134_v5  ;;  %v1158_v9 = vmax.f32 %v1132_v2, 0.0 }
 0x39e   : > { %v1161_v8 = vmax.f32 %v1143_v4, 0.0 }
 0x39f   : > { %v1159_v10 = vmax.f32 %v1135_v6, 0.0 }
 0x3a0   : > { %v1169_v11 = vpack.c.bf16 %v1161_v8, %v1160_v7 }
 0x3a1   : > { %v1168_v12 = vpack.c.bf16 %v1159_v10, %v1158_v9 }
 0x3a3   : > { %1840 = vmatprep.mubr.msk.bf16.mxu0 %vm1185_vm2, %v1168_v12 }
 0x3a4   : > { %1841 = vmatmul.mubr.msk.bf16.gmra.mrb[44].mxu0 %vm1185_vm2, %v1169_v11 }
 0x45f   : > { %v1830_v14 = vpop.f32.mrb[32].mxu0 }
 0x460   : > { %v2145_v15 = vadd.f32 %v1830_v14, %v2136_v13  ;;  %v1244_v16 = vpop.f32.mrb[33].mxu0 }
 0x461   : > { %v2148_v17 = vadd.f32 %v2136_v13, %v1244_v16  ;;  %v1831_v18 = vpop.f32.mrb[34].mxu0 }
 0x462   : > { %1310 = vst.msk [vmem:[%s2142_s25 + $0x10] sm:$0xff] %vm1307_vm3, %v2145_v15  ;;  %v2154_v19 = vadd.f32 %v1831_v18, %v2136_v13  ;;  %v1247_v20 = vpop.f32.mrb[35].mxu0  ;;  %v1330_v21 = vsel %vm1307_vm3, %v2145_v15, -inf }
 0x463   : > { %1308 = vst.msk [vmem:[%s2142_s25] sm:$0xff] %vm1307_vm3, %v2148_v17  ;;  %v2162_v22 = vadd.f32 %v2136_v13, %v1247_v20  ;;  %1331 = vmax.xlane.f32.xlu1 %v1330_v21  ;;  %v1324_v23 = vsel %vm1307_vm3, %v2148_v17, -inf }
 0x464   : > { %1311 = vst.msk [vmem:[%s2142_s25 + $0x18] sm:$0xff] %vm1307_vm3, %v2154_v19  ;;  %1325 = vmax.xlane.f32.xlu0 %v1324_v23  ;;  %v1333_v24 = vsel %vm1307_vm3, %v2154_v19, -inf }
 0x465   : > { %1309 = vst.msk [vmem:[%s2142_s25 + $0x8] sm:$0xff] %vm1307_vm3, %v2162_v22  ;;  %v1327_v26 = vsel %vm1307_vm3, %v2162_v22, -inf }
 0x467   : > { %1334 = vmax.xlane.f32.xlu1 %v1333_v24  ;;  %v1834_v25 = vpop.f32.mrb[36].mxu0 }
 0x468   : > { %v2177_v27 = vadd.f32 %v1834_v25, %v2136_v13  ;;  %v1260_v28 = vpop.f32.mrb[37].mxu0  ;;  %1328 = vmax.xlane.f32.xlu0 %v1327_v26 }
 0x469   : > { %v2180_v29 = vadd.f32 %v2136_v13, %v1260_v28  ;;  %v1835_v30 = vpop.f32.mrb[38].mxu0 }
 0x46a   : > { %1314 = vst.msk [vmem:[%s2142_s25 + $0x30] sm:$0xff] %vm1307_vm3, %v2177_v27  ;;  %v2186_v31 = vadd.f32 %v1835_v30, %v2136_v13  ;;  %v1263_v32 = vpop.f32.mrb[39].mxu0  ;;  %v1342_v33 = vsel %vm1307_vm3, %v2177_v27, -inf }
 0x46b   : > { %1312 = vst.msk [vmem:[%s2142_s25 + $0x20] sm:$0xff] %vm1307_vm3, %v2180_v29  ;;  %v2194_v34 = vadd.f32 %v2136_v13, %v1263_v32  ;;  %v1336_v37 = vsel %vm1307_vm3, %v2180_v29, -inf }
 0x46c   : > { %1315 = vst.msk [vmem:[%s2142_s25 + $0x38] sm:$0xff] %vm1307_vm3, %v2186_v31  ;;  %1343 = vmax.xlane.f32.xlu0 %v1342_v33  ;;  %v1345_v35 = vsel %vm1307_vm3, %v2186_v31, -inf }
 0x46d   : > { %1313 = vst.msk [vmem:[%s2142_s25 + $0x28] sm:$0xff] %vm1307_vm3, %v2194_v34  ;;  %1346 = vmax.xlane.f32.xlu1 %v1345_v35  ;;  %v1339_v40 = vsel %vm1307_vm3, %v2194_v34, -inf }
 0x46f   : > { %v1838_v36 = vpop.f32.mrb[40].mxu0 }
 0x470   : > { %v2207_v38 = vadd.f32 %v1838_v36, %v2136_v13  ;;  %v1276_v39 = vpop.f32.mrb[41].mxu0  ;;  %1337 = vmax.xlane.f32.xlu0 %v1336_v37 }
 0x471   : > { %v2212_v41 = vadd.f32 %v2136_v13, %v1276_v39  ;;  %v1839_v42 = vpop.f32.mrb[42].mxu0  ;;  %1340 = vmax.xlane.f32.xlu1 %v1339_v40 }
 0x472   : > { %1318 = vst.msk [vmem:[%s2142_s25 + $0x50] sm:$0xff] %vm1307_vm3, %v2207_v38  ;;  %v2218_v43 = vadd.f32 %v1839_v42, %v2136_v13  ;;  %v1279_v44 = vpop.f32.mrb[43].mxu0  ;;  %v1354_v45 = vsel %vm1307_vm3, %v2207_v38, -inf }
 0x473   : > { %1316 = vst.msk [vmem:[%s2142_s25 + $0x40] sm:$0xff] %vm1307_vm3, %v2212_v41  ;;  %v2226_v46 = vadd.f32 %v2136_v13, %v1279_v44  ;;  %v1348_v49 = vsel %vm1307_vm3, %v2212_v41, -inf }
 0x474   : > { %1319 = vst.msk [vmem:[%s2142_s25 + $0x58] sm:$0xff] %vm1307_vm3, %v2218_v43  ;;  %1355 = vmax.xlane.f32.xlu0 %v1354_v45  ;;  %v1357_v47 = vsel %vm1307_vm3, %v2218_v43, -inf }
 0x475   : > { %1317 = vst.msk [vmem:[%s2142_s25 + $0x48] sm:$0xff] %vm1307_vm3, %v2226_v46  ;;  %1358 = vmax.xlane.f32.xlu1 %v1357_v47  ;;  %v1351_v52 = vsel %vm1307_vm3, %v2226_v46, -inf }
 0x477   : > { %v1842_v48 = vpop.f32.mrb[44].mxu0 }
 0x478   : > { %v2239_v50 = vadd.f32 %v1842_v48, %v2136_v13  ;;  %v1292_v51 = vpop.f32.mrb[45].mxu0  ;;  %1349 = vmax.xlane.f32.xlu0 %v1348_v49 }
 0x479   : > { %v2244_v53 = vadd.f32 %v2136_v13, %v1292_v51  ;;  %v1843_v54 = vpop.f32.mrb[46].mxu0  ;;  %1352 = vmax.xlane.f32.xlu1 %v1351_v52 }
 0x47a   : > { %1322 = vst.msk [vmem:[%s2142_s25 + $0x70] sm:$0xff] %vm1307_vm3, %v2239_v50  ;;  %v2250_v55 = vadd.f32 %v1843_v54, %v2136_v13  ;;  %v1295_v56 = vpop.f32.mrb[47].mxu0  ;;  %v1366_v60 = vsel %vm1307_vm3, %v2239_v50, -inf }
 0x47b   : > { %1320 = vst.msk [vmem:[%s2142_s25 + $0x60] sm:$0xff] %vm1307_vm3, %v2244_v53  ;;  %v2256_v57 = vadd.f32 %v2136_v13, %v1295_v56  ;;  %v1360_v58 = vsel %vm1307_vm3, %v2244_v53, -inf }
 0x47c   : > { %1323 = vst.msk [vmem:[%s2142_s25 + $0x78] sm:$0xff] %vm1307_vm3, %v2250_v55  ;;  %1361 = vmax.xlane.f32.xlu0 %v1360_v58  ;;  %v1369_v61 = vsel %vm1307_vm3, %v2250_v55, -inf }
 0x47d   : > { %1321 = vst.msk [vmem:[%s2142_s25 + $0x68] sm:$0xff] %vm1307_vm3, %v2256_v57  ;;  %v1363_v59 = vsel %vm1307_vm3, %v2256_v57, -inf }
 0x47e   : > { %1364 = vmax.xlane.f32.xlu1 %v1363_v59 }
 0x480   : > { %1367 = vmax.xlane.f32.xlu0 %v1366_v60 }
 0x482   : > { %1370 = vmax.xlane.f32.xlu1 %v1369_v61 }
 0x4f0   : > { %v1332_v62 = vpop.xlane.xlu1 %1331 }
 0x4f1   : > { %v1374_v63 = vsub.f32 %v2145_v15, %v1332_v62  ;;  %v1326_v0 = vpop.xlane.xlu0 %1325 }
 0x4f2   : > { %v1372_v1 = vsub.f32 %v2148_v17, %v1326_v0 }
 0x4f3   : > { %v1392_v2 = vmul.f32 1.442695, %v1374_v63 }
 0x4f4   : > { %v1388_v3 = vmul.f32 1.442695, %v1372_v1  ;;  %v1335_v4 = vpop.xlane.xlu1 %1334 }
 0x4f5   : > { %1869 = vpow2.f32 %v1392_v2  ;;  %v1375_v5 = vsub.f32 %v2154_v19, %v1335_v4  ;;  %v1329_v6 = vpop.xlane.xlu0 %1328 }
 0x4f6   : > { %v1373_v7 = vsub.f32 %v2162_v22, %v1329_v6  ;;  %1871 = vpow2.f32 %v1388_v3 }
 0x4f7   : > { %v1394_v8 = vmul.f32 1.442695, %v1375_v5 }
 0x4f8   : > { %v1390_v9 = vmul.f32 1.442695, %v1373_v7 }
 0x4f9   : > { %1873 = vpow2.f32 %v1394_v8  ;;  %v1344_v10 = vpop.xlane.xlu0 %1343 }
 0x4fa   : > { %v1378_v11 = vsub.f32 %v2177_v27, %v1344_v10  ;;  %v1347_v12 = vpop.xlane.xlu1 %1346  ;;  %1875 = vpow2.f32 %v1390_v9 }
 0x4fb   : > { %v1379_v13 = vsub.f32 %v2186_v31, %v1347_v12 }
 0x4fc   : > { %v1400_v14 = vmul.f32 1.442695, %v1378_v11 }
 0x4fd   : > { %v1402_v15 = vmul.f32 1.442695, %v1379_v13  ;;  %v1338_v16 = vpop.xlane.xlu0 %1337 }
 0x4fe   : > { %1877 = vpow2.f32 %v1400_v14  ;;  %v1376_v17 = vsub.f32 %v2180_v29, %v1338_v16  ;;  %v1341_v18 = vpop.xlane.xlu1 %1340 }
 0x4ff   : > { %v2279_v19 = vpop.eup %1869  ;;  %1879 = vpow2.f32 %v1402_v15  ;;  %v1377_v20 = vsub.f32 %v2194_v34, %v1341_v18 }
 0x500   : > { %v1396_v21 = vmul.f32 1.442695, %v1376_v17  ;;  %v1426_v22 = vsel %vm1307_vm3, %v2279_v19, 0.0  ;;  %v2284_v23 = vpop.eup %1871 }
 0x501   : > { %v1398_v24 = vmul.f32 1.442695, %v1377_v20  ;;  %1427 = vadd.xlane.f32.xlu0 %v1426_v22  ;;  %v1356_v25 = vpop.xlane.xlu0 %1355  ;;  %v1420_v32 = vsel %vm1307_vm3, %v2284_v23, 0.0 }
 0x502   : > { %1881 = vpow2.f32 %v1396_v21  ;;  %v1382_v26 = vsub.f32 %v2207_v38, %v1356_v25  ;;  %v1359_v27 = vpop.xlane.xlu1 %1358 }
 0x503   : > { %v2287_v28 = vpop.eup %1873  ;;  %1883 = vpow2.f32 %v1398_v24  ;;  %v1383_v29 = vsub.f32 %v2218_v43, %v1359_v27 }
 0x504   : > { %v1408_v30 = vmul.f32 1.442695, %v1382_v26  ;;  %v1429_v31 = vsel %vm1307_vm3, %v2287_v28, 0.0  ;;  %v2294_v33 = vpop.eup %1875 }
 0x505   : > { %v1410_v34 = vmul.f32 1.442695, %v1383_v29  ;;  %1430 = vadd.xlane.f32.xlu1 %v1429_v31  ;;  %1421 = vadd.xlane.f32.xlu0 %v1420_v32  ;;  %v1350_v35 = vpop.xlane.xlu0 %1349  ;;  %v1423_v42 = vsel %vm1307_vm3, %v2294_v33, 0.0 }
 0x506   : > { %1885 = vpow2.f32 %v1408_v30  ;;  %v1380_v36 = vsub.f32 %v2212_v41, %v1350_v35  ;;  %v1353_v37 = vpop.xlane.xlu1 %1352 }
 0x507   : > { %1887 = vpow2.f32 %v1410_v34  ;;  %v1381_v38 = vsub.f32 %v2226_v46, %v1353_v37 }
 0x508   : > { %v2298_v39 = vpop.eup %1877  ;;  %v1404_v40 = vmul.f32 1.442695, %v1380_v36 }
 0x509   : > { %v2302_v43 = vpop.eup %1879  ;;  %v1406_v44 = vmul.f32 1.442695, %v1381_v38  ;;  %1424 = vadd.xlane.f32.xlu1 %v1423_v42  ;;  %v1362_v45 = vpop.xlane.xlu0 %1361  ;;  %v1438_v47 = vsel %vm1307_vm3, %v2298_v39, 0.0 }
 0x50a   : > { %1889 = vpow2.f32 %v1404_v40  ;;  %v1384_v41 = vsub.f32 %v2244_v53, %v1362_v45  ;;  %1439 = vadd.xlane.f32.xlu0 %v1438_v47  ;;  %v1441_v52 = vsel %vm1307_vm3, %v2302_v43, 0.0 }
 0x50b   : > { %1891 = vpow2.f32 %v1406_v44  ;;  %v1365_v46 = vpop.xlane.xlu1 %1364 }
 0x50c   : > { %v2307_v48 = vpop.eup %1881  ;;  %v1412_v49 = vmul.f32 1.442695, %v1384_v41  ;;  %v1385_v51 = vsub.f32 %v2256_v57, %v1365_v46 }
 0x50d   : > { %v2312_v54 = vpop.eup %1883  ;;  %1442 = vadd.xlane.f32.xlu1 %v1441_v52  ;;  %v1368_v56 = vpop.xlane.xlu0 %1367  ;;  %v1432_v58 = vsel %vm1307_vm3, %v2307_v48, 0.0 }
 0x50e   : > { %1893 = vpow2.f32 %v1412_v49  ;;  %v1414_v53 = vmul.f32 1.442695, %v1385_v51  ;;  %v1386_v59 = vsub.f32 %v2239_v50, %v1368_v56  ;;  %1433 = vadd.xlane.f32.xlu0 %v1432_v58  ;;  %v1435_v63 = vsel %vm1307_vm3, %v2312_v54, 0.0 }
 0x50f   : > { %v1371_v60 = vpop.xlane.xlu1 %1370 }
 0x510   : > { %v2317_v61 = vpop.eup %1885  ;;  %1895 = vpow2.f32 %v1414_v53  ;;  %v1416_v57 = vmul.f32 1.442695, %v1386_v59  ;;  %v1387_v62 = vsub.f32 %v2250_v55, %v1371_v60 }
 0x511   : > { %v2322_v0 = vpop.eup %1887  ;;  %1436 = vadd.xlane.f32.xlu1 %v1435_v63  ;;  %v1450_v1 = vsel %vm1307_vm3, %v2317_v61, 0.0 }
 0x512   : > { %1897 = vpow2.f32 %v1416_v57  ;;  %v1418_v2 = vmul.f32 1.442695, %v1387_v62  ;;  %1451 = vadd.xlane.f32.xlu0 %v1450_v1  ;;  %v1453_v3 = vsel %vm1307_vm3, %v2322_v0, 0.0 }
 0x514   : > { %v2326_v50 = vpop.eup %1889  ;;  %1899 = vpow2.f32 %v1418_v2 }
 0x515   : > { %v2330_v4 = vpop.eup %1891  ;;  %1454 = vadd.xlane.f32.xlu1 %v1453_v3  ;;  %v1444_v55 = vsel %vm1307_vm3, %v2326_v50, 0.0 }
 0x516   : > { %1445 = vadd.xlane.f32.xlu0 %v1444_v55  ;;  %v1447_v6 = vsel %vm1307_vm3, %v2330_v4, 0.0 }
 0x518   : > { %v2334_v5 = vpop.eup %1893 }
 0x519   : > { %1448 = vadd.xlane.f32.xlu1 %v1447_v6  ;;  %v1456_v7 = vsel %vm1307_vm3, %v2334_v5, 0.0 }
 0x51a   : > { %v2340_v8 = vpop.eup %1895  ;;  %1457 = vadd.xlane.f32.xlu0 %v1456_v7 }
 0x51b   : > { %v1459_v9 = vsel %vm1307_vm3, %v2340_v8, 0.0 }
 0x51c   : > { %v2344_v10 = vpop.eup %1897 }
 0x51d   : > { %1460 = vadd.xlane.f32.xlu1 %v1459_v9  ;;  %v1462_v11 = vsel %vm1307_vm3, %v2344_v10, 0.0 }
 0x51e   : > { %v2348_v12 = vpop.eup %1899  ;;  %1463 = vadd.xlane.f32.xlu0 %v1462_v11 }
 0x51f   : > { %v1465_v13 = vsel %vm1307_vm3, %v2348_v12, 0.0 }
 0x521   : > { %1466 = vadd.xlane.f32.xlu1 %v1465_v13 }
 0x58e   : > { %v1428_v14 = vpop.xlane.xlu0 %1427 }
 0x58f   : > { %1901 = vrcp.f32 %v1428_v14 }
 0x592   : > { %v1431_v15 = vpop.xlane.xlu1 %1430  ;;  %v1422_v16 = vpop.xlane.xlu0 %1421 }
 0x593   : > { %1903 = vrcp.f32 %v1431_v15 }
 0x594   : > { %1905 = vrcp.f32 %v1422_v16 }
 0x596   : > { %v1425_v17 = vpop.xlane.xlu1 %1424 }
 0x597   : > { %1907 = vrcp.f32 %v1425_v17  ;;  %v1440_v18 = vpop.xlane.xlu0 %1439 }
 0x598   : > { %1909 = vrcp.f32 %v1440_v18 }
 0x599   : > { %v1902_v20 = vpop.eup %1901 }
 0x59a   : > { %v1486_v21 = vmul.f32 %v1902_v20, %v2279_v19  ;;  %v1443_v22 = vpop.xlane.xlu1 %1442 }
 0x59b   : > { %1911 = vrcp.f32 %v1443_v22  ;;  %v1434_v24 = vpop.xlane.xlu0 %1433 }
 0x59c   : > { %1502 = vst.msk [vmem:[%s2356_s28 + $0x10] sm:$0xff] %vm1307_vm3, %v1486_v21  ;;  %1913 = vrcp.f32 %v1434_v24 }
 0x59d   : > { %v1904_v25 = vpop.eup %1903 }
 0x59e   : > { %v1906_v26 = vpop.eup %1905  ;;  %v1487_v27 = vmul.f32 %v1904_v25, %v2287_v28  ;;  %v1437_v29 = vpop.xlane.xlu1 %1436 }
 0x59f   : > { %v1484_v30 = vmul.f32 %v1906_v26, %v2284_v23  ;;  %1915 = vrcp.f32 %v1437_v29  ;;  %v1452_v31 = vpop.xlane.xlu0 %1451 }
 0x5a0   : > { %1503 = vst.msk [vmem:[%s2356_s28 + $0x18] sm:$0xff] %vm1307_vm3, %v1487_v27  ;;  %1917 = vrcp.f32 %v1452_v31 }
 0x5a1   : > { %v1908_v19 = vpop.eup %1907  ;;  %1500 = vst.msk [vmem:[%s2356_s28] sm:$0xff] %vm1307_vm3, %v1484_v30 }
 0x5a2   : > { %v1910_v32 = vpop.eup %1909  ;;  %v1485_v34 = vmul.f32 %v1908_v19, %v2294_v33  ;;  %v1455_v35 = vpop.xlane.xlu1 %1454 }
 0x5a3   : > { %v1490_v36 = vmul.f32 %v1910_v32, %v2298_v39  ;;  %1919 = vrcp.f32 %v1455_v35  ;;  %v1446_v28 = vpop.xlane.xlu0 %1445 }
 0x5a4   : > { %1501 = vst.msk [vmem:[%s2356_s28 + $0x8] sm:$0xff] %vm1307_vm3, %v1485_v34  ;;  %1921 = vrcp.f32 %v1446_v28 }
 0x5a5   : > { %v1912_v23 = vpop.eup %1911  ;;  %1506 = vst.msk [vmem:[%s2356_s28 + $0x30] sm:$0xff] %vm1307_vm3, %v1490_v36 }
 0x5a6   : > { %v1914_v37 = vpop.eup %1913  ;;  %v1491_v38 = vmul.f32 %v1912_v23, %v2302_v43  ;;  %v1449_v40 = vpop.xlane.xlu1 %1448 }
 0x5a7   : > { %v1488_v42 = vmul.f32 %v1914_v37, %v2307_v48  ;;  %1923 = vrcp.f32 %v1449_v40  ;;  %v1458_v33 = vpop.xlane.xlu0 %1457 }
 0x5a8   : > { %1507 = vst.msk [vmem:[%s2356_s28 + $0x38] sm:$0xff] %vm1307_vm3, %v1491_v38  ;;  %1925 = vrcp.f32 %v1458_v33 }
 0x5a9   : > { %v1916_v39 = vpop.eup %1915  ;;  %1504 = vst.msk [vmem:[%s2356_s28 + $0x20] sm:$0xff] %vm1307_vm3, %v1488_v42 }
 0x5aa   : > { %v1918_v44 = vpop.eup %1917  ;;  %v1489_v45 = vmul.f32 %v1916_v39, %v2312_v54  ;;  %v1461_v47 = vpop.xlane.xlu1 %1460 }
 0x5ab   : > { %v1494_v43 = vmul.f32 %v1918_v44, %v2317_v61  ;;  %1927 = vrcp.f32 %v1461_v47  ;;  %v1464_v41 = vpop.xlane.xlu0 %1463 }
 0x5ac   : > { %1505 = vst.msk [vmem:[%s2356_s28 + $0x28] sm:$0xff] %vm1307_vm3, %v1489_v45  ;;  %1929 = vrcp.f32 %v1464_v41 }
 0x5ad   : > { %v1920_v46 = vpop.eup %1919  ;;  %1510 = vst.msk [vmem:[%s2356_s28 + $0x50] sm:$0xff] %vm1307_vm3, %v1494_v43 }
 0x5ae   : > { %v1922_v48 = vpop.eup %1921  ;;  %v1495_v49 = vmul.f32 %v1920_v46, %v2322_v0  ;;  %v1467_v51 = vpop.xlane.xlu1 %1466 }
 0x5af   : > { %v1492_v52 = vmul.f32 %v1922_v48, %v2326_v50  ;;  %1931 = vrcp.f32 %v1467_v51 }
 0x5b0   : > { %1511 = vst.msk [vmem:[%s2356_s28 + $0x58] sm:$0xff] %vm1307_vm3, %v1495_v49 }
 0x5b1   : > { %v1924_v54 = vpop.eup %1923  ;;  %1508 = vst.msk [vmem:[%s2356_s28 + $0x40] sm:$0xff] %vm1307_vm3, %v1492_v52 }
 0x5b2   : > { %v1926_v56 = vpop.eup %1925  ;;  %v1493_v58 = vmul.f32 %v1924_v54, %v2330_v4 }
 0x5b3   : > { %v1496_v53 = vmul.f32 %v1926_v56, %v2334_v5 }
 0x5b4   : > { %1509 = vst.msk [vmem:[%s2356_s28 + $0x48] sm:$0xff] %vm1307_vm3, %v1493_v58 }
 0x5b5   : > { %v1928_v59 = vpop.eup %1927  ;;  %1512 = vst.msk [vmem:[%s2356_s28 + $0x60] sm:$0xff] %vm1307_vm3, %v1496_v53 }
 0x5b6   : > { %v1930_v60 = vpop.eup %1929  ;;  %v1497_v61 = vmul.f32 %v1928_v59, %v2340_v8 }
 0x5b7   : > { %v1498_v57 = vmul.f32 %v1930_v60, %v2344_v10 }
 0x5b8   : > { %1513 = vst.msk [vmem:[%s2356_s28 + $0x68] sm:$0xff] %vm1307_vm3, %v1497_v61 }
 0x5b9   : > { %v1932_v62 = vpop.eup %1931  ;;  %1514 = vst.msk [vmem:[%s2356_s28 + $0x70] sm:$0xff] %vm1307_vm3, %v1498_v57 }
 0x5ba   : > { %v1499_v63 = vmul.f32 %v1932_v62, %v2348_v12 }
 0x5bc   : > { %1515 = vst.msk [vmem:[%s2356_s28 + $0x78] sm:$0xff] %vm1307_vm3, %v1499_v63 }
 0x5bd PF: > { %s23_s21 = sadd.s32 1, %s1939_s21  }
 0x5be   : > { %p20_p4 = scmp.ge.s32.totalorder %s23_s21, 4  }
 0x5c0   :  { %22 = sbr.rel (!%p20_p4) target bundleno = 1 (0x1), region = 106 }

</bundles_post_ra>
